<compile_context>
chip_gen: v6e
topology: v6e:2x2x1
jax: 0.10.0
libtpu: 0.0.40
codegen_flags: <defaults>
</compile_context>

<pallas_src>
import functools

import jax
import jax.numpy as jnp
import numpy as np
from jax.experimental import pallas as pl
from jax.experimental.pallas import tpu as pltpu

N_HID = 200          # logical hidden size (PyTorch spec)
N_HID_PAD = 256      # padded to a clean lane multiple
DROP_P = 0.2
KEEP_P = 1.0 - DROP_P
# keep an element iff its uint32 random bits < KEEP_P * 2^32 (exact integer compare)
KEEP_THRESHOLD = np.uint32(int(KEEP_P * (1 << 32)))


def _round_up(x, m):
    return (x + m - 1) // m * m


def mlp_kernel(x_ref,
               w1_ref, b1_ref, w2_ref, b2_ref, w3_ref, b3_ref, w4_ref, b4_ref,
               r1_ref, r2_ref, r3_ref,
               o_ref):
    thresh = jnp.uint32(KEEP_THRESHOLD)

    h = jnp.dot(x_ref[...], w1_ref[...],
                preferred_element_type=jnp.float32) + b1_ref[...]
    # fused ReLU + dropout keep-mask; 1/keep_p scale is folded into w2/w3/w4.
    h = jnp.where((r1_ref[...] < thresh) & (h > 0.0), h, 0.0)

    h = jnp.dot(h, w2_ref[...], preferred_element_type=jnp.float32) + b2_ref[...]
    h = jnp.where((r2_ref[...] < thresh) & (h > 0.0), h, 0.0)

    h = jnp.dot(h, w3_ref[...], preferred_element_type=jnp.float32) + b3_ref[...]
    h = jnp.where((r3_ref[...] < thresh) & (h > 0.0), h, 0.0)

    h = jnp.dot(h, w4_ref[...], preferred_element_type=jnp.float32) + b4_ref[...]
    o_ref[...] = jax.nn.sigmoid(h)


def init_params(key, n_in, n_out, n_hid=N_HID):
    """nn.Linear-style init; weights stored as [in_features, out_features]."""
    dims = [(n_in, n_hid), (n_hid, n_hid), (n_hid, n_hid), (n_hid, n_out)]
    params = {}
    for i, (d_in, d_out) in enumerate(dims, start=1):
        key, kw, kb = jax.random.split(key, 3)
        bound = 1.0 / float(np.sqrt(d_in))
        params[f"w{i}"] = jax.random.uniform(
            kw, (d_in, d_out), jnp.float32, minval=-bound, maxval=bound)
        params[f"b{i}"] = jax.random.uniform(
            kb, (1, d_out), jnp.float32, minval=-bound, maxval=bound)
    return params


def prepare_params(params, n_out_pad):
    """Zero-pad hidden 200->256 and output -> n_out_pad lanes, and fold the
    1/keep_p inverted-dropout scale into w2/w3/w4 (one-time host rescale)."""
    hp = N_HID_PAD - N_HID
    n_out = params["w4"].shape[1]
    inv_keep = 1.0 / KEEP_P

    w1 = jnp.pad(params["w1"], ((0, 0), (0, hp)))
    b1 = jnp.pad(params["b1"], ((0, 0), (0, hp)))
    w2 = jnp.pad(params["w2"] * inv_keep, ((0, hp), (0, hp)))
    b2 = jnp.pad(params["b2"], ((0, 0), (0, hp)))
    w3 = jnp.pad(params["w3"] * inv_keep, ((0, hp), (0, hp)))
    b3 = jnp.pad(params["b3"], ((0, 0), (0, hp)))
    w4 = jnp.pad(params["w4"] * inv_keep, ((0, hp), (0, n_out_pad - n_out)))
    b4 = jnp.pad(params["b4"], ((0, 0), (0, n_out_pad - n_out)))
    return (w1, b1, w2, b2, w3, b3, w4, b4)


def make_dropout_bits(key, batch):
    """Three uint32 [batch, N_HID_PAD] arrays, one per dropout layer."""
    ks = jax.random.split(key, 3)
    return tuple(jax.random.bits(k, (batch, N_HID_PAD), dtype=jnp.uint32)
                 for k in ks)


@functools.partial(jax.jit, static_argnames=("n_out", "block_b"))
def net_forward(x, padded_params, rbits, *, n_out, block_b=128):
    """x: [B, n_in] f32; padded_params from prepare_params; rbits from
    make_dropout_bits (caller must pass a fresh key per training step)."""
    w1, b1, w2, b2, w3, b3, w4, b4 = padded_params
    B, n_in = x.shape
    n_out_pad = w4.shape[1]

    tb = min(block_b, _round_up(B, 8))
    b_pad = _round_up(B, tb)
    if b_pad != B:
        pad = ((0, b_pad - B), (0, 0))
        x = jnp.pad(x, pad)
        rbits = tuple(jnp.pad(r, pad) for r in rbits)

    resident = lambda shape: pl.BlockSpec(shape, lambda i: (0, 0))   # weights
    batched = lambda shape: pl.BlockSpec(shape, lambda i: (i, 0))    # activations

    out = pl.pallas_call(
        mlp_kernel,
        out_shape=jax.ShapeDtypeStruct((b_pad, n_out_pad), jnp.float32),
        grid=(b_pad // tb,),
        in_specs=[
            batched((tb, n_in)),
            resident((n_in, N_HID_PAD)), resident((1, N_HID_PAD)),
            resident((N_HID_PAD, N_HID_PAD)), resident((1, N_HID_PAD)),
            resident((N_HID_PAD, N_HID_PAD)), resident((1, N_HID_PAD)),
            resident((N_HID_PAD, n_out_pad)), resident((1, n_out_pad)),
            batched((tb, N_HID_PAD)),
            batched((tb, N_HID_PAD)),
            batched((tb, N_HID_PAD)),
        ],
        out_specs=batched((tb, n_out_pad)),
        compiler_params=pltpu.CompilerParams(
            dimension_semantics=("parallel",)),
    )(x, w1, b1, w2, b2, w3, b3, w4, b4, *rbits)

    return out[:B, :n_out]


def reference_forward(x, params, rbits):
    """Pure-JAX reference using the same dropout bits (for verification)."""
    hi = jax.lax.Precision.HIGHEST
    keep = lambda r, h: (r[:, :N_HID] < KEEP_THRESHOLD) & (h > 0.0)

    h = jnp.dot(x, params["w1"], precision=hi) + params["b1"]
    h = jnp.where(keep(rbits[0], h), h / KEEP_P, 0.0)
    h = jnp.dot(h, params["w2"], precision=hi) + params["b2"]
    h = jnp.where(keep(rbits[1], h), h / KEEP_P, 0.0)
    h = jnp.dot(h, params["w3"], precision=hi) + params["b3"]
    h = jnp.where(keep(rbits[2], h), h / KEEP_P, 0.0)
    h = jnp.dot(h, params["w4"], precision=hi) + params["b4"]
    return jax.nn.sigmoid(h)


if __name__ == "__main__":
    key = jax.random.PRNGKey(0)
    k_param, k_x, k_drop = jax.random.split(key, 3)

    B, n_in, n_out = 8, 32, 16
    params = init_params(k_param, n_in, n_out)
    x = jax.random.normal(k_x, (B, n_in), jnp.float32)

    n_out_pad = _round_up(max(n_out, 128), 128)
    padded_params = prepare_params(params, n_out_pad)
    rbits = make_dropout_bits(k_drop, B)

    y = net_forward(x, padded_params, rbits, n_out=n_out)
    y = jax.block_until_ready(y)

    assert y.shape == (B, n_out)
    assert bool(jnp.all((y >= 0.0) & (y <= 1.0)))

    y_ref = reference_forward(x, params, rbits)
    assert bool(jnp.allclose(y, y_ref, atol=2e-3, rtol=2e-3)), (
        "max abs err %e" % float(jnp.max(jnp.abs(y - y_ref))))

    print("KERNEL_OK")
</pallas_src>

<mosaic_0001>
module attributes {stable_mosaic.version = 11 : i64} {
  func.func @mlp_kernel(%arg0: i32, %arg1: memref<8x32xf32, #tpu.memory_space<vmem>>, %arg2: memref<32x256xf32, #tpu.memory_space<vmem>>, %arg3: memref<1x256xf32, #tpu.memory_space<vmem>>, %arg4: memref<256x256xf32, #tpu.memory_space<vmem>>, %arg5: memref<1x256xf32, #tpu.memory_space<vmem>>, %arg6: memref<256x256xf32, #tpu.memory_space<vmem>>, %arg7: memref<1x256xf32, #tpu.memory_space<vmem>>, %arg8: memref<256x128xf32, #tpu.memory_space<vmem>>, %arg9: memref<1x128xf32, #tpu.memory_space<vmem>>, %arg10: memref<8x256xi32, #tpu.memory_space<vmem>>, %arg11: memref<8x256xi32, #tpu.memory_space<vmem>>, %arg12: memref<8x256xi32, #tpu.memory_space<vmem>>, %arg13: memref<8x128xf32, #tpu.memory_space<vmem>>) attributes {dimension_semantics = [#tpu.dimension_semantics<parallel>], iteration_bounds = array<i64: 1>, scalar_prefetch = 0 : i64, scratch_operands = 0 : i64, tpu.core_type = #tpu.core_type<tc>, window_params = [{transform_indices = @transform_0, window_bounds = array<i64: 8, 32>}, {pipeline_mode = #tpu.pipeline_mode<synchronous>, transform_indices = @transform_1, window_bounds = array<i64: 32, 256>}, {pipeline_mode = #tpu.pipeline_mode<synchronous>, transform_indices = @transform_2, window_bounds = array<i64: 1, 256>}, {pipeline_mode = #tpu.pipeline_mode<synchronous>, transform_indices = @transform_3, window_bounds = array<i64: 256, 256>}, {pipeline_mode = #tpu.pipeline_mode<synchronous>, transform_indices = @transform_4, window_bounds = array<i64: 1, 256>}, {pipeline_mode = #tpu.pipeline_mode<synchronous>, transform_indices = @transform_5, window_bounds = array<i64: 256, 256>}, {pipeline_mode = #tpu.pipeline_mode<synchronous>, transform_indices = @transform_6, window_bounds = array<i64: 1, 256>}, {pipeline_mode = #tpu.pipeline_mode<synchronous>, transform_indices = @transform_7, window_bounds = array<i64: 256, 128>}, {pipeline_mode = #tpu.pipeline_mode<synchronous>, transform_indices = @transform_8, window_bounds = array<i64: 1, 128>}, {transform_indices = @transform_9, window_bounds = array<i64: 8, 256>}, {transform_indices = @transform_10, window_bounds = array<i64: 8, 256>}, {transform_indices = @transform_11, window_bounds = array<i64: 8, 256>}, {transform_indices = @transform_12, window_bounds = array<i64: 8, 128>}]} {
    %c0 = arith.constant 0 : index
    %c0_0 = arith.constant 0 : index
    %0 = vector.load %arg1[%c0, %c0_0] : memref<8x32xf32, #tpu.memory_space<vmem>>, vector<8x32xf32>
    %c0_1 = arith.constant 0 : index
    %c0_2 = arith.constant 0 : index
    %1 = vector.load %arg2[%c0_1, %c0_2] : memref<32x256xf32, #tpu.memory_space<vmem>>, vector<32x256xf32>
    %cst = arith.constant dense<0.000000e+00> : vector<8x256xf32>
    %2 = tpu.matmul %0, %1, %cst {dimension_numbers = #tpu.dot_dimension_numbers<[1], [0], [0], [1], [0, 0, 1, 1], [], []>} : vector<8x32xf32>, vector<32x256xf32>, vector<8x256xf32> -> vector<8x256xf32>
    %c0_3 = arith.constant 0 : index
    %c0_4 = arith.constant 0 : index
    %3 = vector.load %arg3[%c0_3, %c0_4] : memref<1x256xf32, #tpu.memory_space<vmem>>, vector<1x256xf32>
    %4 = vector.broadcast %3 : vector<1x256xf32> to vector<8x256xf32>
    %5 = arith.addf %2, %4 : vector<8x256xf32>
    %c0_5 = arith.constant 0 : index
    %c0_6 = arith.constant 0 : index
    %6 = vector.load %arg10[%c0_5, %c0_6] : memref<8x256xi32, #tpu.memory_space<vmem>>, vector<8x256xi32>
    %c-858993460_i32 = arith.constant -858993460 : i32
    %7 = vector.broadcast %c-858993460_i32 : i32 to vector<8x256xi32>
    %8 = arith.cmpi ult, %6, %7 : vector<8x256xi32>
    %cst_7 = arith.constant 0.000000e+00 : f32
    %9 = vector.broadcast %cst_7 : f32 to vector<8x256xf32>
    %10 = arith.cmpf ogt, %5, %9 : vector<8x256xf32>
    %11 = arith.andi %8, %10 : vector<8x256xi1>
    %cst_8 = arith.constant 0.000000e+00 : f32
    %12 = vector.broadcast %cst_8 : f32 to vector<8x256xf32>
    %13 = arith.select %11, %5, %12 : vector<8x256xi1>, vector<8x256xf32>
    %c0_9 = arith.constant 0 : index
    %c0_10 = arith.constant 0 : index
    %14 = vector.load %arg4[%c0_9, %c0_10] : memref<256x256xf32, #tpu.memory_space<vmem>>, vector<256x256xf32>
    %cst_11 = arith.constant dense<0.000000e+00> : vector<8x256xf32>
    %15 = tpu.matmul %13, %14, %cst_11 {dimension_numbers = #tpu.dot_dimension_numbers<[1], [0], [0], [1], [0, 0, 1, 1], [], []>} : vector<8x256xf32>, vector<256x256xf32>, vector<8x256xf32> -> vector<8x256xf32>
    %c0_12 = arith.constant 0 : index
    %c0_13 = arith.constant 0 : index
    %16 = vector.load %arg5[%c0_12, %c0_13] : memref<1x256xf32, #tpu.memory_space<vmem>>, vector<1x256xf32>
    %17 = vector.broadcast %16 : vector<1x256xf32> to vector<8x256xf32>
    %18 = arith.addf %15, %17 : vector<8x256xf32>
    %c0_14 = arith.constant 0 : index
    %c0_15 = arith.constant 0 : index
    %19 = vector.load %arg11[%c0_14, %c0_15] : memref<8x256xi32, #tpu.memory_space<vmem>>, vector<8x256xi32>
    %c-858993460_i32_16 = arith.constant -858993460 : i32
    %20 = vector.broadcast %c-858993460_i32_16 : i32 to vector<8x256xi32>
    %21 = arith.cmpi ult, %19, %20 : vector<8x256xi32>
    %cst_17 = arith.constant 0.000000e+00 : f32
    %22 = vector.broadcast %cst_17 : f32 to vector<8x256xf32>
    %23 = arith.cmpf ogt, %18, %22 : vector<8x256xf32>
    %24 = arith.andi %21, %23 : vector<8x256xi1>
    %cst_18 = arith.constant 0.000000e+00 : f32
    %25 = vector.broadcast %cst_18 : f32 to vector<8x256xf32>
    %26 = arith.select %24, %18, %25 : vector<8x256xi1>, vector<8x256xf32>
    %c0_19 = arith.constant 0 : index
    %c0_20 = arith.constant 0 : index
    %27 = vector.load %arg6[%c0_19, %c0_20] : memref<256x256xf32, #tpu.memory_space<vmem>>, vector<256x256xf32>
    %cst_21 = arith.constant dense<0.000000e+00> : vector<8x256xf32>
    %28 = tpu.matmul %26, %27, %cst_21 {dimension_numbers = #tpu.dot_dimension_numbers<[1], [0], [0], [1], [0, 0, 1, 1], [], []>} : vector<8x256xf32>, vector<256x256xf32>, vector<8x256xf32> -> vector<8x256xf32>
    %c0_22 = arith.constant 0 : index
    %c0_23 = arith.constant 0 : index
    %29 = vector.load %arg7[%c0_22, %c0_23] : memref<1x256xf32, #tpu.memory_space<vmem>>, vector<1x256xf32>
    %30 = vector.broadcast %29 : vector<1x256xf32> to vector<8x256xf32>
    %31 = arith.addf %28, %30 : vector<8x256xf32>
    %c0_24 = arith.constant 0 : index
    %c0_25 = arith.constant 0 : index
    %32 = vector.load %arg12[%c0_24, %c0_25] : memref<8x256xi32, #tpu.memory_space<vmem>>, vector<8x256xi32>
    %c-858993460_i32_26 = arith.constant -858993460 : i32
    %33 = vector.broadcast %c-858993460_i32_26 : i32 to vector<8x256xi32>
    %34 = arith.cmpi ult, %32, %33 : vector<8x256xi32>
    %cst_27 = arith.constant 0.000000e+00 : f32
    %35 = vector.broadcast %cst_27 : f32 to vector<8x256xf32>
    %36 = arith.cmpf ogt, %31, %35 : vector<8x256xf32>
    %37 = arith.andi %34, %36 : vector<8x256xi1>
    %cst_28 = arith.constant 0.000000e+00 : f32
    %38 = vector.broadcast %cst_28 : f32 to vector<8x256xf32>
    %39 = arith.select %37, %31, %38 : vector<8x256xi1>, vector<8x256xf32>
    %c0_29 = arith.constant 0 : index
    %c0_30 = arith.constant 0 : index
    %40 = vector.load %arg8[%c0_29, %c0_30] : memref<256x128xf32, #tpu.memory_space<vmem>>, vector<256x128xf32>
    %cst_31 = arith.constant dense<0.000000e+00> : vector<8x128xf32>
    %41 = tpu.matmul %39, %40, %cst_31 {dimension_numbers = #tpu.dot_dimension_numbers<[1], [0], [0], [1], [0, 0, 1, 1], [], []>} : vector<8x256xf32>, vector<256x128xf32>, vector<8x128xf32> -> vector<8x128xf32>
    %c0_32 = arith.constant 0 : index
    %c0_33 = arith.constant 0 : index
    %42 = vector.load %arg9[%c0_32, %c0_33] : memref<1x128xf32, #tpu.memory_space<vmem>>, vector<1x128xf32>
    %43 = vector.broadcast %42 : vector<1x128xf32> to vector<8x128xf32>
    %44 = arith.addf %41, %43 : vector<8x128xf32>
    %45 = arith.negf %44 : vector<8x128xf32>
    %46 = math.exp %45 : vector<8x128xf32>
    %cst_34 = arith.constant 1.000000e+00 : f32
    %47 = vector.broadcast %cst_34 : f32 to vector<8x128xf32>
    %48 = arith.addf %47, %46 : vector<8x128xf32>
    %49 = arith.divf %47, %48 : vector<8x128xf32>
    %c0_35 = arith.constant 0 : index
    %c0_36 = arith.constant 0 : index
    %50 = vector.load %arg13[%c0_35, %c0_36] : memref<8x128xf32, #tpu.memory_space<vmem>>, vector<8x128xf32>
    tpu.vector_store %arg13[%c0_35, %c0_36], %49 {strides = array<i32>} : memref<8x128xf32, #tpu.memory_space<vmem>>, vector<8x128xf32>,
    return
  }
  func.func @transform_0(%arg0: i32) -> (i32, i32) {
    %c0_i32 = arith.constant 0 : i32
    %c0_i32_0 = arith.constant 0 : i32
    return %arg0, %c0_i32 : i32, i32
  }
  func.func @transform_1(%arg0: i32) -> (i32, i32) {
    %c0_i32 = arith.constant 0 : i32
    %c0_i32_0 = arith.constant 0 : i32
    %c0_i32_1 = arith.constant 0 : i32
    return %c0_i32, %c0_i32_0 : i32, i32
  }
  func.func @transform_2(%arg0: i32) -> (i32, i32) {
    %c0_i32 = arith.constant 0 : i32
    %c0_i32_0 = arith.constant 0 : i32
    %c0_i32_1 = arith.constant 0 : i32
    return %c0_i32, %c0_i32_0 : i32, i32
  }
  func.func @transform_3(%arg0: i32) -> (i32, i32) {
    %c0_i32 = arith.constant 0 : i32
    %c0_i32_0 = arith.constant 0 : i32
    %c0_i32_1 = arith.constant 0 : i32
    return %c0_i32, %c0_i32_0 : i32, i32
  }
  func.func @transform_4(%arg0: i32) -> (i32, i32) {
    %c0_i32 = arith.constant 0 : i32
    %c0_i32_0 = arith.constant 0 : i32
    %c0_i32_1 = arith.constant 0 : i32
    return %c0_i32, %c0_i32_0 : i32, i32
  }
  func.func @transform_5(%arg0: i32) -> (i32, i32) {
    %c0_i32 = arith.constant 0 : i32
    %c0_i32_0 = arith.constant 0 : i32
    %c0_i32_1 = arith.constant 0 : i32
    return %c0_i32, %c0_i32_0 : i32, i32
  }
  func.func @transform_6(%arg0: i32) -> (i32, i32) {
    %c0_i32 = arith.constant 0 : i32
    %c0_i32_0 = arith.constant 0 : i32
    %c0_i32_1 = arith.constant 0 : i32
    return %c0_i32, %c0_i32_0 : i32, i32
  }
  func.func @transform_7(%arg0: i32) -> (i32, i32) {
    %c0_i32 = arith.constant 0 : i32
    %c0_i32_0 = arith.constant 0 : i32
    %c0_i32_1 = arith.constant 0 : i32
    return %c0_i32, %c0_i32_0 : i32, i32
  }
  func.func @transform_8(%arg0: i32) -> (i32, i32) {
    %c0_i32 = arith.constant 0 : i32
    %c0_i32_0 = arith.constant 0 : i32
    %c0_i32_1 = arith.constant 0 : i32
    return %c0_i32, %c0_i32_0 : i32, i32
  }
  func.func @transform_9(%arg0: i32) -> (i32, i32) {
    %c0_i32 = arith.constant 0 : i32
    %c0_i32_0 = arith.constant 0 : i32
    return %arg0, %c0_i32 : i32, i32
  }
  func.func @transform_10(%arg0: i32) -> (i32, i32) {
    %c0_i32 = arith.constant 0 : i32
    %c0_i32_0 = arith.constant 0 : i32
    return %arg0, %c0_i32 : i32, i32
  }
  func.func @transform_11(%arg0: i32) -> (i32, i32) {
    %c0_i32 = arith.constant 0 : i32
    %c0_i32_0 = arith.constant 0 : i32
    return %arg0, %c0_i32 : i32, i32
  }
  func.func @transform_12(%arg0: i32) -> (i32, i32) {
    %c0_i32 = arith.constant 0 : i32
    %c0_i32_0 = arith.constant 0 : i32
    return %arg0, %c0_i32 : i32, i32
  }
}

</mosaic_0001>

<bundles_post_ra>
// kernel: net_forward.1
= control target key start
LH: loop header
LB: loop body
LE: loop exit
PB: predicated region body
PF: predicated region fallthrough
CT: control target
= control target key end

     0   :  { %17 = vsyncpa [#allocation3], 0  ;;  %s1186_s0 = inlined_call_operand.hbm [shape: f32[8,32], index: 0, kind: input, shape index: {}]   ;;  %s1187_s1 = inlined_call_operand.hbm [shape: f32[32,256], index: 1, kind: input, shape index: {}]   ;;  %s1188_s2 = inlined_call_operand.hbm [shape: f32[1,256], index: 2, kind: input, shape index: {}]   ;;  %s1189_s3 = inlined_call_operand.hbm [shape: f32[256,256], index: 3, kind: input, shape index: {}]   ;;  %s1190_s4 = inlined_call_operand.hbm [shape: f32[1,256], index: 4, kind: input, shape index: {}]   ;;  %s1191_s5 = inlined_call_operand.hbm [shape: f32[256,256], index: 5, kind: input, shape index: {}]   ;;  %s1192_s6 = inlined_call_operand.hbm [shape: f32[1,256], index: 6, kind: input, shape index: {}]   ;;  %s1193_s7 = inlined_call_operand.hbm [shape: f32[256,128], index: 7, kind: input, shape index: {}]   ;;  %s1194_s8 = inlined_call_operand.hbm [shape: f32[1,128], index: 8, kind: input, shape index: {}]   ;;  %s1195_s9 = inlined_call_operand.vmem [shape: u32[8,256], index: 9, kind: input, shape index: {}]   ;;  %s1196_s10 = inlined_call_operand.hbm [shape: u32[8,256], index: 10, kind: input, shape index: {}]   ;;  %s1197_s11 = inlined_call_operand.hbm [shape: u32[8,256], index: 11, kind: input, shape index: {}]   ;;  %s1198_s12 = inlined_call_operand.hbm [shape: f32[8,128], index: 12, kind: output, shape index: {}]  }
   0x1   :  { %18 = vsyncpa [#allocation6], 0 }
   0x2   :  { %19 = vsyncpa [#allocation9], 0 }
   0x3   :  { %20 = vsyncpa [#allocation12], 0 }
   0x4   :  { %21 = vsyncpa [#allocation15], 0 }
   0x5   :  { %22 = vsyncpa [#allocation18], 0 }
   0x6   :  { %23 = vsyncpa [#allocation4], 0  ;;  %s1052_s21 = smov [#allocation5]  }
   0x7   :  { %s39_s22 = sshll.u32 %s1052_s21, 4  ;;  %s40_s22 = int_to_ptr.vmem [resolvable:$true] %s39_s22 }
   0x8   :  { %s806_s23 = scalar_lea.vmem %s40_s22, 1024  ;;  %p811_p1 = scmp.lt.s32.totalorder %s40_s22, %s40_s22 }
   0x9   :  { %p807_p0 = scmp.ne.s32.totalorder %s40_s22, %s806_s23  ;;  %p812_p2 = scmp.lt.s32.totalorder %s806_s23, %s806_s23 }
   0xb   :  { %p813_p3 = por %p812_p2, %p811_p1 }
   0xd   :  { %p814_p4 = pnand %p813_p3, %p807_p0 }
   0xf   :  { %817 = shalt.err (!%p814_p4)
}
  0x10   :  { %s1053_s24 = smov 256   ;;  %s1054_s25 = smov 16  }
  0x11   :  { %45 = dma.hbm_to_vmem [thread:$0]  %s1187_s1, 1024, %s40_s22, [#allocation6], %s1053_s24, %s1053_s24, %s1054_s25  }
  0x12   :  { %s1055_s28 = smov [#allocation8]   ;;  %s1056_s30 = smov [#allocation11]  }
  0x13   :  { %s61_s29 = sshll.u32 %s1055_s28, 4  ;;  %s83_s13 = sshll.u32 %s1056_s30, 4  ;;  %s62_s29 = int_to_ptr.vmem [resolvable:$true] %s61_s29  ;;  %s84_s13 = int_to_ptr.vmem [resolvable:$true] %s83_s13 }
  0x14   :  { %s826_s14 = scalar_lea.vmem %s62_s29, 8192  ;;  %p831_p6 = scmp.lt.s32.totalorder %s62_s29, %s62_s29 }
  0x15   :  { %p827_p5 = scmp.ne.s32.totalorder %s62_s29, %s826_s14  ;;  %p832_p7 = scmp.lt.s32.totalorder %s826_s14, %s826_s14 }
  0x17   :  { %p833_p8 = por %p832_p7, %p831_p6 }
  0x19   :  { %p834_p9 = pnand %p833_p8, %p827_p5 }
  0x1b   :  { %837 = shalt.err (!%p834_p9)
}
  0x1c   :  { %67 = dma.hbm_to_vmem [thread:$0]  %s1189_s3, 8192, %s62_s29, [#allocation9], %s1053_s24, %s1053_s24, %s1054_s25  }
  0x1d   :  { %s846_s17 = scalar_lea.vmem %s84_s13, 8192  ;;  %p851_p11 = scmp.lt.s32.totalorder %s84_s13, %s84_s13 }
  0x1e   :  { %p847_p10 = scmp.ne.s32.totalorder %s84_s13, %s846_s17  ;;  %p852_p12 = scmp.lt.s32.totalorder %s846_s17, %s846_s17 }
  0x20   :  { %p853_p13 = por %p852_p12, %p851_p11 }
  0x22   :  { %p854_p0 = pnand %p853_p13, %p847_p10 }
  0x24   :  { %857 = shalt.err (!%p854_p0)
}
  0x25   :  { %89 = dma.hbm_to_vmem [thread:$0]  %s1191_s5, 8192, %s84_s13, [#allocation12], %s1053_s24, %s1053_s24, %s1054_s25  }
  0x26   :  { %s1057_s19 = smov [#allocation14]  }
  0x27   :  { %s105_s20 = sshll.u32 %s1057_s19, 4  ;;  %s106_s20 = int_to_ptr.vmem [resolvable:$true] %s105_s20 }
  0x28   :  { %s866_s21 = scalar_lea.vmem %s106_s20, 4096  ;;  %p871_p2 = scmp.lt.s32.totalorder %s106_s20, %s106_s20 }
  0x29   :  { %p867_p1 = scmp.ne.s32.totalorder %s106_s20, %s866_s21  ;;  %p872_p3 = scmp.lt.s32.totalorder %s866_s21, %s866_s21 }
  0x2b   :  { %p873_p4 = por %p872_p3, %p871_p2 }
  0x2d   :  { %p874_p5 = pnand %p873_p4, %p867_p1 }
  0x2f   :  { %877 = shalt.err (!%p874_p5)
}
  0x30   :  { %s1058_s3 = smov 128   ;;  %s1059_s22 = smov 8  }
  0x31   :  { %111 = dma.hbm_to_vmem [thread:$0]  %s1193_s7, 4096, %s106_s20, [#allocation15], %s1058_s3, %s1058_s3, %s1059_s22  }
  0x32   :  { %s1060_s27 = smov [#allocation17]   ;;  %s1061_s29 = smov [#allocation2]  }
  0x33   :  { %s130_s28 = sshll.u32 %s1060_s27, 4  ;;  %s30_s5 = sshll.u32 %s1061_s29, 4  ;;  %s131_s28 = int_to_ptr.vmem [resolvable:$true] %s130_s28  ;;  %s31_s5 = int_to_ptr.vmem [resolvable:$true] %s30_s5 }
  0x34   :  { %s886_s24 = scalar_lea.vmem %s131_s28, 256  ;;  %p891_p7 = scmp.lt.s32.totalorder %s131_s28, %s131_s28 }
  0x35   :  { %p887_p6 = scmp.ne.s32.totalorder %s131_s28, %s886_s24  ;;  %p892_p8 = scmp.lt.s32.totalorder %s886_s24, %s886_s24 }
  0x37   :  { %p893_p9 = por %p892_p8, %p891_p7 }
  0x39   :  { %p894_p10 = pnand %p893_p9, %p887_p6 }
  0x3b   :  { %897 = shalt.err (!%p894_p10)
}
  0x3c   :  { %133 = dma.hbm_to_vmem [thread:$0]  %s1196_s10, 256, %s131_s28, [#allocation18]  }
  0x3d   :  { %s906_s13 = scalar_lea.vmem %s31_s5, 128  ;;  %p911_p12 = scmp.lt.s32.totalorder %s31_s5, %s31_s5 }
  0x3e   :  { %p907_p11 = scmp.ne.s32.totalorder %s31_s5, %s906_s13  ;;  %p912_p13 = scmp.lt.s32.totalorder %s906_s13, %s906_s13 }
  0x40   :  { %p913_p0 = por %p912_p13, %p911_p12 }
  0x42   :  { %p914_p1 = pnand %p913_p0, %p907_p11 }
  0x44   :  { %917 = shalt.err (!%p914_p1)
}
  0x45   :  { %33 = dma.hbm_to_vmem [thread:$0]  %s1186_s0, 128, %s31_s5, [#allocation3]  }
  0x46   :  { %s1062_s15 = smov [#allocation7]   ;;  %s1063_s17 = smov [#allocation10]  }
  0x47   :  { %s52_s16 = sshll.u32 %s1062_s15, 4  ;;  %s74_s1 = sshll.u32 %s1063_s17, 4  ;;  %s53_s16 = int_to_ptr.vmem [resolvable:$true] %s52_s16  ;;  %s75_s1 = int_to_ptr.vmem [resolvable:$true] %s74_s1 }
  0x48   :  { %s926_s18 = scalar_lea.vmem %s53_s16, 32  ;;  %p931_p3 = scmp.lt.s32.totalorder %s53_s16, %s53_s16 }
  0x49   :  { %p927_p2 = scmp.ne.s32.totalorder %s53_s16, %s926_s18  ;;  %p932_p4 = scmp.lt.s32.totalorder %s926_s18, %s926_s18 }
  0x4b   :  { %p933_p5 = por %p932_p4, %p931_p3 }
  0x4d   :  { %p934_p6 = pnand %p933_p5, %p927_p2 }
  0x4f   :  { %937 = shalt.err (!%p934_p6)
}
  0x50   :  { %55 = dma.hbm_to_vmem [thread:$0]  %s1188_s2, 32, %s53_s16, [#allocation6]  }
  0x51   :  { %s946_s20 = scalar_lea.vmem %s75_s1, 32  ;;  %p951_p8 = scmp.lt.s32.totalorder %s75_s1, %s75_s1 }
  0x52   :  { %p947_p7 = scmp.ne.s32.totalorder %s75_s1, %s946_s20  ;;  %p952_p9 = scmp.lt.s32.totalorder %s946_s20, %s946_s20 }
  0x54   :  { %p953_p10 = por %p952_p9, %p951_p8 }
  0x56   :  { %p954_p11 = pnand %p953_p10, %p947_p7 }
  0x58   :  { %957 = shalt.err (!%p954_p11)
}
  0x59   :  { %77 = dma.hbm_to_vmem [thread:$0]  %s1190_s4, 32, %s75_s1, [#allocation9]  }
  0x5a   :  { %s1064_s3 = smov [#allocation13]   ;;  %s1065_s23 = smov [#allocation16]  }
  0x5b   :  { %s96_s22 = sshll.u32 %s1064_s3, 4  ;;  %s118_s26 = sshll.u32 %s1065_s23, 4  ;;  %s97_s22 = int_to_ptr.vmem [resolvable:$true] %s96_s22  ;;  %s119_s26 = int_to_ptr.vmem [resolvable:$true] %s118_s26 }
  0x5c   :  { %s966_s27 = scalar_lea.vmem %s97_s22, 32  ;;  %p971_p13 = scmp.lt.s32.totalorder %s97_s22, %s97_s22 }
  0x5d   :  { %p967_p12 = scmp.ne.s32.totalorder %s97_s22, %s966_s27  ;;  %p972_p0 = scmp.lt.s32.totalorder %s966_s27, %s966_s27 }
  0x5f   :  { %p973_p1 = por %p972_p0, %p971_p13 }
  0x61   :  { %p974_p2 = pnand %p973_p1, %p967_p12 }
  0x63   :  { %977 = shalt.err (!%p974_p2)
}
  0x64   :  { %99 = dma.hbm_to_vmem [thread:$0]  %s1192_s6, 32, %s97_s22, [#allocation12]  }
  0x65   :  { %s986_s29 = scalar_lea.vmem %s119_s26, 16  ;;  %s990_s4 = scalar_lea.vmem %s119_s26, 32 }
  0x66   :  { %p987_p3 = scmp.ne.s32.totalorder %s119_s26, %s986_s29  ;;  %p991_p4 = scmp.lt.s32.totalorder %s119_s26, %s119_s26 }
  0x67   :  { %p992_p5 = scmp.lt.s32.totalorder %s990_s4, %s986_s29 }
  0x69   :  { %p993_p6 = por %p992_p5, %p991_p4 }
  0x6b   :  { %p994_p7 = pnand %p993_p6, %p987_p3 }
  0x6d   :  { %997 = shalt.err (!%p994_p7)
}
  0x6e   :  { %121 = dma.hbm_to_vmem [thread:$0]  %s1194_s8, 16, %s119_s26, [#allocation15]  }
  0x6f   :  { %s1066_s25 = smov [#allocation19]  }
  0x70   :  { %s140_s30 = sshll.u32 %s1066_s25, 4  ;;  %s141_s30 = int_to_ptr.vmem [resolvable:$true] %s140_s30 }
  0x71   :  { %s1006_s13 = scalar_lea.vmem %s141_s30, 256  ;;  %p1011_p9 = scmp.lt.s32.totalorder %s141_s30, %s141_s30 }
  0x72   :  { %p1007_p8 = scmp.ne.s32.totalorder %s141_s30, %s1006_s13  ;;  %p1012_p10 = scmp.lt.s32.totalorder %s1006_s13, %s1006_s13 }
  0x74   :  { %p1013_p11 = por %p1012_p10, %p1011_p9 }
  0x76   :  { %p1014_p12 = pnand %p1013_p11, %p1007_p8 }
  0x78   :  { %1017 = shalt.err (!%p1014_p12)
}
  0x79   :  { %143 = dma.hbm_to_vmem [thread:$0]  %s1197_s11, 256, %s141_s30, [#allocation18]  }
  0x7a   :  { %1038 = dma.done.wait [#allocation3], 128  }
  0x7b   :  { %1039 = vsyncadd [#allocation3], 4294967168 }
  0x7c   :  { %1040 = dma.done.wait [#allocation6], 1056  }
  0x7d   :  { %1041 = vsyncadd [#allocation6], 4294966240 }
  0x7e   :  { %1042 = dma.done.wait [#allocation9], 8224  }
  0x7f   :  { %1043 = vsyncadd [#allocation9], 4294959072 }
  0x80   :  { %1044 = dma.done.wait [#allocation12], 8224  }
  0x81   :  { %1045 = vsyncadd [#allocation12], 4294959072 }
  0x82   :  { %1046 = dma.done.wait [#allocation15], 4112  }
  0x83   :  { %1047 = vsyncadd [#allocation15], 4294963184 }
  0x84   :  { %1048 = dma.done.wait [#allocation18], 512  }
  0x85   :  { %1049 = vsyncadd [#allocation18], 4294966784  ;;  %v1067_v0 = vmov 0.0   ;;  %v185_v1 = vld [vmem:[#allocation5 + $0x38] sm:$0xff]  ;;  %v184_v2 = vld [vmem:[#allocation5 + $0x30] sm:$0xff]  ;;  %vm198_vm0 = vcmask 261120  }
  0x86   :  { %266 = vmatprep.mubr.f32.mxu0 %v1067_v0  ;;  %v183_v3 = vld [vmem:[#allocation5 + $0x28] sm:$0xff]  ;;  %226 = vmatprep.subr.mxu0 %v185_v1  ;;  %v182_v4 = vld [vmem:[#allocation5 + $0x20] sm:$0xff]  ;;  %v181_v5 = vld [vmem:[#allocation5 + $0x18] sm:$0xff] }
  0x87   :  { %227 = vmatpush1.msra.mxu0 %v184_v2  ;;  %v180_v6 = vld [vmem:[#allocation5 + $0x10] sm:$0xff]  ;;  %v314_v7 = vld [vmem:[#allocation8 + $0xf8] sm:$0xff]  ;;  %v179_v10 = vld [vmem:[#allocation5 + $0x8] sm:$0xff] }
  0x88   :  { %228 = vmatprep.subr.mxu0 %v183_v3  ;;  %v313_v8 = vld [vmem:[#allocation8 + $0xf0] sm:$0xff]  ;;  %v312_v9 = vld [vmem:[#allocation8 + $0xe8] sm:$0xff]  ;;  %359 = vmatprep.subr.mxu1 %v314_v7  ;;  %v311_v11 = vld [vmem:[#allocation8 + $0xe0] sm:$0xff] }
  0x89   :  { %229 = vmatpush1.msra.mxu0 %v182_v4  ;;  %v178_v12 = vld [vmem:[#allocation5] sm:$0xff]  ;;  %360 = vmatpush1.msra.mxu1 %v313_v8  ;;  %v177_v14 = vld [vmem:[#allocation2] sm:$0xff]  ;;  %v308_v16 = vld [vmem:[#allocation8 + $0xc8] sm:$0xff] }
  0x8a   :  { %230 = vmatprep.subr.mxu0 %v181_v5  ;;  %v310_v13 = vld [vmem:[#allocation8 + $0xd8] sm:$0xff]  ;;  %361 = vmatprep.subr.mxu1 %v312_v9  ;;  %v309_v15 = vld [vmem:[#allocation8 + $0xd0] sm:$0xff]  ;;  %v307_v17 = vld [vmem:[#allocation8 + $0xc0] sm:$0xff] }
  0x8b   :  { %231 = vmatpush1.msra.mxu0 %v180_v6  ;;  %362 = vmatpush1.msra.mxu1 %v311_v11  ;;  %v306_v18 = vld [vmem:[#allocation8 + $0xb8] sm:$0xff]  ;;  %v305_v19 = vld [vmem:[#allocation8 + $0xb0] sm:$0xff]  ;;  %v304_v20 = vld [vmem:[#allocation8 + $0xa8] sm:$0xff] }
  0x8c   :  { %232 = vmatprep.subr.mxu0 %v179_v10  ;;  %363 = vmatprep.subr.mxu1 %v310_v13  ;;  %v303_v21 = vld [vmem:[#allocation8 + $0xa0] sm:$0xff]  ;;  %v302_v22 = vld [vmem:[#allocation8 + $0x98] sm:$0xff]  ;;  %v301_v23 = vld [vmem:[#allocation8 + $0x90] sm:$0xff] }
  0x8d   :  { %233 = vmatpush1.msra.mxu0 %v178_v12  ;;  %364 = vmatpush1.msra.mxu1 %v309_v15  ;;  %v300_v24 = vld [vmem:[#allocation8 + $0x88] sm:$0xff]  ;;  %v299_v25 = vld [vmem:[#allocation8 + $0x80] sm:$0xff]  ;;  %v298_v26 = vld [vmem:[#allocation8 + $0x78] sm:$0xff] }
  0x8e   :  { %733 = vmatmul.mubr.msk.f32.vlgmr.msra.gmra.mxu0 %vm198_vm0, %v177_v14  ;;  %365 = vmatprep.subr.mxu1 %v308_v16  ;;  %v297_v27 = vld [vmem:[#allocation8 + $0x70] sm:$0xff]  ;;  %v296_v28 = vld [vmem:[#allocation8 + $0x68] sm:$0xff]  ;;  %v295_v29 = vld [vmem:[#allocation8 + $0x60] sm:$0xff] }
  0x8f   :  { %366 = vmatpush1.msra.mxu1 %v307_v17  ;;  %v294_v30 = vld [vmem:[#allocation8 + $0x58] sm:$0xff]  ;;  %v293_v31 = vld [vmem:[#allocation8 + $0x50] sm:$0xff]  ;;  %v292_v32 = vld [vmem:[#allocation8 + $0x48] sm:$0xff] }
  0x90   :  { %367 = vmatprep.subr.mxu1 %v306_v18  ;;  %v291_v33 = vld [vmem:[#allocation8 + $0x40] sm:$0xff]  ;;  %v290_v34 = vld [vmem:[#allocation8 + $0x38] sm:$0xff]  ;;  %v289_v35 = vld [vmem:[#allocation8 + $0x30] sm:$0xff] }
  0x91   :  { %368 = vmatpush1.msra.mxu1 %v305_v19  ;;  %v288_v36 = vld [vmem:[#allocation8 + $0x28] sm:$0xff]  ;;  %v287_v37 = vld [vmem:[#allocation8 + $0x20] sm:$0xff]  ;;  %v286_v38 = vld [vmem:[#allocation8 + $0x18] sm:$0xff] }
  0x92   :  { %369 = vmatprep.subr.mxu1 %v304_v20  ;;  %v285_v39 = vld [vmem:[#allocation8 + $0x10] sm:$0xff]  ;;  %v284_v40 = vld [vmem:[#allocation8 + $0x8] sm:$0xff]  ;;  %v283_v41 = vld [vmem:[#allocation8] sm:$0xff] }
  0x93   :  { %370 = vmatpush1.msra.mxu1 %v303_v21  ;;  %v346_v42 = vld [vmem:[#allocation8 + $0x1f8] sm:$0xff]  ;;  %v345_v43 = vld [vmem:[#allocation8 + $0x1f0] sm:$0xff]  ;;  %v344_v44 = vld [vmem:[#allocation8 + $0x1e8] sm:$0xff] }
  0x94   :  { %371 = vmatprep.subr.mxu1 %v302_v22  ;;  %v343_v45 = vld [vmem:[#allocation8 + $0x1e0] sm:$0xff]  ;;  %v342_v46 = vld [vmem:[#allocation8 + $0x1d8] sm:$0xff]  ;;  %v341_v47 = vld [vmem:[#allocation8 + $0x1d0] sm:$0xff] }
  0x95   :  { %372 = vmatpush1.msra.mxu1 %v301_v23  ;;  %v340_v48 = vld [vmem:[#allocation8 + $0x1c8] sm:$0xff]  ;;  %v339_v49 = vld [vmem:[#allocation8 + $0x1c0] sm:$0xff]  ;;  %v338_v50 = vld [vmem:[#allocation8 + $0x1b8] sm:$0xff] }
  0x96   :  { %373 = vmatprep.subr.mxu1 %v300_v24  ;;  %v337_v51 = vld [vmem:[#allocation8 + $0x1b0] sm:$0xff]  ;;  %v336_v52 = vld [vmem:[#allocation8 + $0x1a8] sm:$0xff]  ;;  %v335_v53 = vld [vmem:[#allocation8 + $0x1a0] sm:$0xff] }
  0x97   :  { %374 = vmatpush1.msra.mxu1 %v299_v25  ;;  %v334_v54 = vld [vmem:[#allocation8 + $0x198] sm:$0xff]  ;;  %v333_v55 = vld [vmem:[#allocation8 + $0x190] sm:$0xff]  ;;  %v332_v56 = vld [vmem:[#allocation8 + $0x188] sm:$0xff] }
  0x98   :  { %375 = vmatprep.subr.mxu1 %v298_v26  ;;  %v331_v57 = vld [vmem:[#allocation8 + $0x180] sm:$0xff]  ;;  %v330_v58 = vld [vmem:[#allocation8 + $0x178] sm:$0xff]  ;;  %v329_v59 = vld [vmem:[#allocation8 + $0x170] sm:$0xff] }
  0x99   :  { %376 = vmatpush1.msra.mxu1 %v297_v27  ;;  %v328_v60 = vld [vmem:[#allocation8 + $0x168] sm:$0xff]  ;;  %v327_v61 = vld [vmem:[#allocation8 + $0x160] sm:$0xff]  ;;  %v326_v62 = vld [vmem:[#allocation8 + $0x158] sm:$0xff] }
  0x9a   :  { %377 = vmatprep.subr.mxu1 %v296_v28  ;;  %v325_v63 = vld [vmem:[#allocation8 + $0x150] sm:$0xff]  ;;  %v324_v0 = vld [vmem:[#allocation8 + $0x148] sm:$0xff]  ;;  %v323_v1 = vld [vmem:[#allocation8 + $0x140] sm:$0xff] }
  0x9b   :  { %378 = vmatpush1.msra.mxu1 %v295_v29  ;;  %v322_v2 = vld [vmem:[#allocation8 + $0x138] sm:$0xff]  ;;  %v321_v3 = vld [vmem:[#allocation8 + $0x130] sm:$0xff]  ;;  %v320_v4 = vld [vmem:[#allocation8 + $0x128] sm:$0xff] }
  0x9c   :  { %379 = vmatprep.subr.mxu1 %v294_v30  ;;  %v319_v5 = vld [vmem:[#allocation8 + $0x120] sm:$0xff]  ;;  %v318_v6 = vld [vmem:[#allocation8 + $0x118] sm:$0xff]  ;;  %v317_v7 = vld [vmem:[#allocation8 + $0x110] sm:$0xff] }
  0x9d   :  { %380 = vmatpush1.msra.mxu1 %v293_v31  ;;  %v316_v8 = vld [vmem:[#allocation8 + $0x108] sm:$0xff]  ;;  %v315_v9 = vld [vmem:[#allocation8 + $0x100] sm:$0xff]  ;;  %v470_v11 = vld [vmem:[#allocation11 + $0xf0] sm:$0xff] }
  0x9e   :  { %381 = vmatprep.subr.mxu1 %v292_v32  ;;  %v471_v10 = vld [vmem:[#allocation11 + $0xf8] sm:$0xff]  ;;  %v469_v12 = vld [vmem:[#allocation11 + $0xe8] sm:$0xff]  ;;  %v468_v13 = vld [vmem:[#allocation11 + $0xe0] sm:$0xff] }
  0x9f   :  { %382 = vmatpush1.msra.mxu1 %v291_v33  ;;  %516 = vmatprep.subr.mxu0 %v471_v10  ;;  %v467_v14 = vld [vmem:[#allocation11 + $0xd8] sm:$0xff]  ;;  %v466_v15 = vld [vmem:[#allocation11 + $0xd0] sm:$0xff]  ;;  %v465_v16 = vld [vmem:[#allocation11 + $0xc8] sm:$0xff] }
  0xa0   :  { %383 = vmatprep.subr.mxu1 %v290_v34  ;;  %517 = vmatpush1.msra.mxu0 %v470_v11  ;;  %v464_v17 = vld [vmem:[#allocation11 + $0xc0] sm:$0xff]  ;;  %v463_v18 = vld [vmem:[#allocation11 + $0xb8] sm:$0xff]  ;;  %v462_v19 = vld [vmem:[#allocation11 + $0xb0] sm:$0xff] }
  0xa1   :  { %384 = vmatpush1.msra.mxu1 %v289_v35  ;;  %518 = vmatprep.subr.mxu0 %v469_v12  ;;  %v461_v20 = vld [vmem:[#allocation11 + $0xa8] sm:$0xff]  ;;  %v460_v21 = vld [vmem:[#allocation11 + $0xa0] sm:$0xff]  ;;  %v459_v22 = vld [vmem:[#allocation11 + $0x98] sm:$0xff] }
  0xa2   :  { %385 = vmatprep.subr.mxu1 %v288_v36  ;;  %519 = vmatpush1.msra.mxu0 %v468_v13  ;;  %v458_v23 = vld [vmem:[#allocation11 + $0x90] sm:$0xff]  ;;  %v457_v24 = vld [vmem:[#allocation11 + $0x88] sm:$0xff]  ;;  %v456_v25 = vld [vmem:[#allocation11 + $0x80] sm:$0xff] }
  0xa3   :  { %386 = vmatpush1.msra.mxu1 %v287_v37  ;;  %520 = vmatprep.subr.mxu0 %v467_v14  ;;  %v455_v26 = vld [vmem:[#allocation11 + $0x78] sm:$0xff]  ;;  %v454_v27 = vld [vmem:[#allocation11 + $0x70] sm:$0xff]  ;;  %v453_v28 = vld [vmem:[#allocation11 + $0x68] sm:$0xff] }
  0xa4   :  { %387 = vmatprep.subr.mxu1 %v286_v38  ;;  %521 = vmatpush1.msra.mxu0 %v466_v15  ;;  %v452_v29 = vld [vmem:[#allocation11 + $0x60] sm:$0xff]  ;;  %v451_v30 = vld [vmem:[#allocation11 + $0x58] sm:$0xff]  ;;  %v450_v31 = vld [vmem:[#allocation11 + $0x50] sm:$0xff] }
  0xa5   :  { %388 = vmatpush1.msra.mxu1 %v285_v39  ;;  %522 = vmatprep.subr.mxu0 %v465_v16  ;;  %v449_v32 = vld [vmem:[#allocation11 + $0x48] sm:$0xff]  ;;  %v448_v33 = vld [vmem:[#allocation11 + $0x40] sm:$0xff]  ;;  %v447_v34 = vld [vmem:[#allocation11 + $0x38] sm:$0xff] }
  0xa6   :  { %389 = vmatprep.subr.mxu1 %v284_v40  ;;  %523 = vmatpush1.msra.mxu0 %v464_v17  ;;  %v446_v35 = vld [vmem:[#allocation11 + $0x30] sm:$0xff]  ;;  %v445_v36 = vld [vmem:[#allocation11 + $0x28] sm:$0xff]  ;;  %v444_v37 = vld [vmem:[#allocation11 + $0x20] sm:$0xff] }
  0xa7   :  { %390 = vmatpush1.msra.mxu1 %v283_v41  ;;  %524 = vmatprep.subr.mxu0 %v463_v18  ;;  %v443_v38 = vld [vmem:[#allocation11 + $0x18] sm:$0xff]  ;;  %v442_v39 = vld [vmem:[#allocation11 + $0x10] sm:$0xff]  ;;  %v441_v40 = vld [vmem:[#allocation11 + $0x8] sm:$0xff] }
  0xa8   :  { %391 = vmatprep.subr.mxu1 %v346_v42  ;;  %525 = vmatpush1.msra.mxu0 %v462_v19  ;;  %v440_v41 = vld [vmem:[#allocation11] sm:$0xff]  ;;  %v503_v42 = vld [vmem:[#allocation11 + $0x1f8] sm:$0xff]  ;;  %v478_v16 = vld [vmem:[#allocation11 + $0x130] sm:$0xff] }
  0xa9   :  { %392 = vmatpush2.msra.mxu1 %v345_v43  ;;  %526 = vmatprep.subr.mxu0 %v461_v20  ;;  %v502_v43 = vld [vmem:[#allocation11 + $0x1f0] sm:$0xff]  ;;  %v274_v10 = vld [vmem:[%s1195_s9 + $0x8] sm:$0xff]  ;;  %v477_v17 = vld [vmem:[#allocation11 + $0x128] sm:$0xff] }
  0xaa   :  { %393 = vmatprep.subr.mxu1 %v344_v44  ;;  %527 = vmatpush1.msra.mxu0 %v460_v21  ;;  %v501_v44 = vld [vmem:[#allocation11 + $0x1e8] sm:$0xff]  ;;  %v273_v12 = vld [vmem:[%s1195_s9] sm:$0xff]  ;;  %vm276_vm1 = vcmp.lt.u32.totalorder %v274_v10, 3435973836  ;;  %v476_v18 = vld [vmem:[#allocation11 + $0x120] sm:$0xff]  ;;  %s1068_s9 = smov [#allocation20]  }
  0xab   :  { %394 = vmatpush2.msra.mxu1 %v343_v45  ;;  %528 = vmatprep.subr.mxu0 %v459_v22  ;;  %v500_v45 = vld [vmem:[#allocation11 + $0x1e0] sm:$0xff]  ;;  %vm275_vm3 = vcmp.lt.u32.totalorder %v273_v12, 3435973836  ;;  %v479_v15 = vld [vmem:[#allocation11 + $0x138] sm:$0xff]  ;;  %v474_v20 = vld [vmem:[#allocation11 + $0x110] sm:$0xff]  ;;  %s719_s16 = sshll.u32 %s1068_s9, 4  ;;  %s720_s16 = int_to_ptr.vmem [resolvable:$true] %s719_s16 }
  0xac   :  { %395 = vmatprep.subr.mxu1 %v342_v46  ;;  %529 = vmatpush1.msra.mxu0 %v458_v23  ;;  %v499_v46 = vld [vmem:[#allocation11 + $0x1d8] sm:$0xff]  ;;  %v473_v21 = vld [vmem:[#allocation11 + $0x108] sm:$0xff]  ;;  %v472_v22 = vld [vmem:[#allocation11 + $0x100] sm:$0xff]  ;;  %s1018_s17 = scalar_lea.vmem %s720_s16, 128  ;;  %p1023_p0 = scmp.lt.s32.totalorder %s720_s16, %s720_s16 }
  0xad   :  { %396 = vmatpush2.msra.mxu1 %v341_v47  ;;  %530 = vmatprep.subr.mxu0 %v457_v24  ;;  %v498_v47 = vld [vmem:[#allocation11 + $0x1d0] sm:$0xff]  ;;  %v475_v19 = vld [vmem:[#allocation11 + $0x118] sm:$0xff]  ;;  %v738_v12 = vld [vmem:[#allocation16] ss:$0 sm:$0xff]  ;;  %p1019_p13 = scmp.ne.s32.totalorder %s720_s16, %s1018_s17  ;;  %p1024_p1 = scmp.lt.s32.totalorder %s1018_s17, %s1018_s17 }
  0xae   :  { %397 = vmatprep.subr.mxu1 %v340_v48  ;;  %531 = vmatpush1.msra.mxu0 %v456_v25  ;;  %v497_v48 = vld [vmem:[#allocation11 + $0x1c8] sm:$0xff]  ;;  %v628_v23 = vld [vmem:[#allocation14 + $0xf8] sm:$0xff]  ;;  %v627_v25 = vld [vmem:[#allocation14 + $0xf0] sm:$0xff] }
  0xaf   :  { %398 = vmatpush2.msra.mxu1 %v339_v49  ;;  %532 = vmatprep.subr.mxu0 %v455_v26  ;;  %v496_v49 = vld [vmem:[#allocation11 + $0x1c0] sm:$0xff]  ;;  %v611_v26 = vld [vmem:[#allocation14 + $0x70] sm:$0xff]  ;;  %p1025_p2 = por %p1024_p1, %p1023_p0 }
  0xb0   :  { %399 = vmatprep.subr.mxu1 %v338_v50  ;;  %533 = vmatpush1.msra.mxu0 %v454_v27  ;;  %v495_v50 = vld [vmem:[#allocation11 + $0x1b8] sm:$0xff]  ;;  %v626_v27 = vld [vmem:[#allocation14 + $0xe8] sm:$0xff] }
  0xb1   :  { %400 = vmatpush2.msra.mxu1 %v337_v51  ;;  %534 = vmatprep.subr.mxu0 %v453_v28  ;;  %v494_v51 = vld [vmem:[#allocation11 + $0x1b0] sm:$0xff]  ;;  %v612_v24 = vld [vmem:[#allocation14 + $0x78] sm:$0xff]  ;;  %p1026_p3 = pnand %p1025_p2, %p1019_p13 }
  0xb2   :  { %401 = vmatprep.subr.mxu1 %v336_v52  ;;  %535 = vmatpush1.msra.mxu0 %v452_v29  ;;  %v493_v52 = vld [vmem:[#allocation11 + $0x1a8] sm:$0xff] }
  0xb3   :  { %402 = vmatpush2.msra.mxu1 %v335_v53  ;;  %536 = vmatprep.subr.mxu0 %v451_v30  ;;  %v492_v53 = vld [vmem:[#allocation11 + $0x1a0] sm:$0xff]  ;;  %v610_v28 = vld [vmem:[#allocation14 + $0x68] sm:$0xff] }
  0xb4   :  { %403 = vmatprep.subr.mxu1 %v334_v54  ;;  %537 = vmatpush1.msra.mxu0 %v450_v31  ;;  %v491_v54 = vld [vmem:[#allocation11 + $0x198] sm:$0xff]  ;;  %v625_v29 = vld [vmem:[#allocation14 + $0xe0] sm:$0xff] }
  0xb5   :  { %404 = vmatpush2.msra.mxu1 %v333_v55  ;;  %538 = vmatprep.subr.mxu0 %v449_v32  ;;  %v490_v55 = vld [vmem:[#allocation11 + $0x190] sm:$0xff]  ;;  %v609_v30 = vld [vmem:[#allocation14 + $0x60] sm:$0xff]  ;;  %v624_v31 = vld [vmem:[#allocation14 + $0xd8] sm:$0xff] }
  0xb6   :  { %405 = vmatprep.subr.mxu1 %v332_v56  ;;  %539 = vmatpush1.msra.mxu0 %v448_v33  ;;  %v489_v56 = vld [vmem:[#allocation11 + $0x188] sm:$0xff]  ;;  %v608_v32 = vld [vmem:[#allocation14 + $0x58] sm:$0xff]  ;;  %v623_v33 = vld [vmem:[#allocation14 + $0xd0] sm:$0xff] }
  0xb7   :  { %406 = vmatpush2.msra.mxu1 %v331_v57  ;;  %540 = vmatprep.subr.mxu0 %v447_v34  ;;  %v488_v57 = vld [vmem:[#allocation11 + $0x180] sm:$0xff]  ;;  %v607_v34 = vld [vmem:[#allocation14 + $0x50] sm:$0xff] }
  0xb8   :  { %407 = vmatprep.subr.mxu1 %v330_v58  ;;  %541 = vmatpush1.msra.mxu0 %v446_v35  ;;  %v487_v58 = vld [vmem:[#allocation11 + $0x178] sm:$0xff]  ;;  %v622_v35 = vld [vmem:[#allocation14 + $0xc8] sm:$0xff] }
  0xb9   :  { %408 = vmatpush2.msra.mxu1 %v329_v59  ;;  %542 = vmatprep.subr.mxu0 %v445_v36  ;;  %v486_v59 = vld [vmem:[#allocation11 + $0x170] sm:$0xff] }
  0xba   :  { %409 = vmatprep.subr.mxu1 %v328_v60  ;;  %543 = vmatpush1.msra.mxu0 %v444_v37  ;;  %v485_v60 = vld [vmem:[#allocation11 + $0x168] sm:$0xff] }
  0xbb   :  { %410 = vmatpush2.msra.mxu1 %v327_v61  ;;  %544 = vmatprep.subr.mxu0 %v443_v38  ;;  %v484_v61 = vld [vmem:[#allocation11 + $0x160] sm:$0xff]  ;;  %v606_v36 = vld [vmem:[#allocation14 + $0x48] sm:$0xff] }
  0xbc   :  { %411 = vmatprep.subr.mxu1 %v326_v62  ;;  %545 = vmatpush1.msra.mxu0 %v442_v39  ;;  %v483_v62 = vld [vmem:[#allocation11 + $0x158] sm:$0xff]  ;;  %v621_v37 = vld [vmem:[#allocation14 + $0xc0] sm:$0xff] }
  0xbd   :  { %412 = vmatpush2.msra.mxu1 %v325_v63  ;;  %546 = vmatprep.subr.mxu0 %v441_v40  ;;  %v482_v63 = vld [vmem:[#allocation11 + $0x150] sm:$0xff]  ;;  %v605_v38 = vld [vmem:[#allocation14 + $0x40] sm:$0xff]  ;;  %v620_v39 = vld [vmem:[#allocation14 + $0xb8] sm:$0xff] }
  0xbe   :  { %413 = vmatprep.subr.mxu1 %v324_v0  ;;  %547 = vmatpush1.msra.mxu0 %v440_v41  ;;  %v481_v0 = vld [vmem:[#allocation11 + $0x148] sm:$0xff]  ;;  %v604_v40 = vld [vmem:[#allocation14 + $0x38] sm:$0xff]  ;;  %v619_v41 = vld [vmem:[#allocation14 + $0xb0] sm:$0xff] }
  0xbf   :  { %414 = vmatpush2.msra.mxu1 %v323_v1  ;;  %548 = vmatprep.subr.mxu0 %v503_v42  ;;  %v480_v1 = vld [vmem:[#allocation11 + $0x140] sm:$0xff]  ;;  %v603_v42 = vld [vmem:[#allocation14 + $0x30] sm:$0xff] }
  0xc0   :  { %415 = vmatprep.subr.mxu1 %v322_v2  ;;  %549 = vmatpush2.msra.mxu0 %v502_v43  ;;  %v188_v2 = vlaneseq  ;;  %v618_v43 = vld [vmem:[#allocation14 + $0xa8] sm:$0xff] }
  0xc1   :  { %416 = vmatpush2.msra.mxu1 %v321_v3  ;;  %550 = vmatprep.subr.mxu0 %v501_v44  ;;  %v602_v44 = vld [vmem:[#allocation14 + $0x28] sm:$0xff] }
  0xc2   :  { %417 = vmatprep.subr.mxu1 %v320_v4  ;;  %551 = vmatpush2.msra.mxu0 %v500_v45  ;;  %v189_v3 = vshrl.u32 %v188_v2, 7  ;;  %v617_v45 = vld [vmem:[#allocation14 + $0xa0] sm:$0xff] }
  0xc3   :  { %418 = vmatpush2.msra.mxu1 %v319_v5  ;;  %552 = vmatprep.subr.mxu0 %v499_v46  ;;  %v186_v5 = vld [vmem:[#allocation7] sm:$0x3]  ;;  %v601_v46 = vld [vmem:[#allocation14 + $0x20] sm:$0xff] }
  0xc4   :  { %419 = vmatprep.subr.mxu1 %v318_v6  ;;  %553 = vmatpush2.msra.mxu0 %v498_v47  ;;  %v1167_v4 = vsub.s32 0, %v189_v3  ;;  %v1169_v6 = vsub.s32 1, %v189_v3  ;;  %v347_v47 = vld [vmem:[#allocation10] sm:$0x3] }
  0xc5   :  { %420 = vmatpush2.msra.mxu1 %v317_v7  ;;  %554 = vmatprep.subr.mxu0 %v497_v48 }
  0xc6   :  { %421 = vmatprep.subr.mxu1 %v316_v8  ;;  %555 = vmatpush2.msra.mxu0 %v496_v49  ;;  %v191_v7 = vrot.slane %v186_v5, %v1167_v4  ;;  %v195_v8 = vrot.slane %v186_v5, %v1169_v6  ;;  %v352_v48 = vrot.slane %v347_v47, %v1167_v4  ;;  %v588_v5 = vld [vmem:[#allocation19 + $0x8] sm:$0xff] }
  0xc7   :  { %422 = vmatpush2.msra.mxu1 %v315_v9  ;;  %556 = vmatprep.subr.mxu0 %v495_v50  ;;  %v356_v49 = vrot.slane %v347_v47, %v1169_v6  ;;  %vm590_vm13 = vcmp.lt.u32.totalorder %v588_v5, 3435973836 }
  0xc8   :  { %557 = vmatpush2.msra.mxu0 %v494_v51  ;;  %742 = vmatprep.subr.mxu1 %v628_v23  ;;  %v431_v51 = vld [vmem:[#allocation17 + $0x8] sm:$0xff] }
  0xc9   :  { %558 = vmatprep.subr.mxu0 %v493_v52  ;;  %vm433_vm7 = vcmp.lt.u32.totalorder %v431_v51, 3435973836 }
  0xca   :  { %559 = vmatpush2.msra.mxu0 %v492_v53  ;;  %v430_v53 = vld [vmem:[#allocation17] sm:$0xff] }
  0xcb   :  { %560 = vmatprep.subr.mxu0 %v491_v54  ;;  %vm432_vm8 = vcmp.lt.u32.totalorder %v430_v53, 3435973836 }
  0xcc   :  { %561 = vmatpush2.msra.mxu0 %v490_v55 }
  0xcd   :  { %562 = vmatprep.subr.mxu0 %v489_v56  ;;  %v616_v56 = vld [vmem:[#allocation14 + $0x98] sm:$0xff] }
  0xce   :  { %563 = vmatpush2.msra.mxu0 %v488_v57  ;;  %v600_v57 = vld [vmem:[#allocation14 + $0x18] sm:$0xff] }
  0xcf   :  { %564 = vmatprep.subr.mxu0 %v487_v58  ;;  %v615_v58 = vld [vmem:[#allocation14 + $0x90] sm:$0xff] }
  0xd0   :  { %565 = vmatpush2.msra.mxu0 %v486_v59  ;;  %v599_v59 = vld [vmem:[#allocation14 + $0x10] sm:$0xff] }
  0xd1   :  { %566 = vmatprep.subr.mxu0 %v485_v60  ;;  %v614_v60 = vld [vmem:[#allocation14 + $0x88] sm:$0xff] }
  0xd2   :  { %567 = vmatpush2.msra.mxu0 %v484_v61  ;;  %v598_v61 = vld [vmem:[#allocation14 + $0x8] sm:$0xff] }
  0xd3   :  { %568 = vmatprep.subr.mxu0 %v483_v62  ;;  %v613_v62 = vld [vmem:[#allocation14 + $0x80] sm:$0xff] }
  0xd4   :  { %569 = vmatpush2.msra.mxu0 %v482_v63  ;;  %v597_v63 = vld [vmem:[#allocation14] sm:$0xff] }
  0xd5   :  { %570 = vmatprep.subr.mxu0 %v481_v0  ;;  %v504_v0 = vld [vmem:[#allocation13] sm:$0x3] }
  0xd6   :  { %571 = vmatpush2.msra.mxu0 %v480_v1  ;;  %v509_v1 = vrot.slane %v504_v0, %v1167_v4  ;;  %v513_v2 = vrot.slane %v504_v0, %v1169_v6 }
  0xd7   :  { %572 = vmatprep.subr.mxu0 %v479_v15 }
  0xd8   :  { %573 = vmatpush2.msra.mxu0 %v478_v16 }
  0xd9   :  { %574 = vmatprep.subr.mxu0 %v477_v17 }
  0xda   :  { %575 = vmatpush2.msra.mxu0 %v476_v18 }
  0xdb   :  { %576 = vmatprep.subr.mxu0 %v475_v19 }
  0xdc   :  { %577 = vmatpush2.msra.mxu0 %v474_v20 }
  0xdd   :  { %578 = vmatprep.subr.mxu0 %v473_v21 }
  0xde   :  { %579 = vmatpush2.msra.mxu0 %v472_v22 }
 0x14e   :  { %v268_v9 = vpop.f32.mrf.mxu0 }
 0x14f   :  { %v269_v11 = vadd.f32 %v268_v9, %v191_v7 }
 0x150   :  { %v270_v13 = vpop.f32.mrf.mxu0 }
 0x151   :  { %v271_v14 = vadd.f32 %v270_v13, %v195_v8  ;;  %vm277_vm2 = vcmp.gt.f32.partialorder %v269_v11, 0.0  ;;  %v587_v8 = vld [vmem:[#allocation19] sm:$0xff] }
 0x152   :  { %vm279_vm6 = vmand %vm275_vm3, %vm277_vm2  ;;  %vm589_vm14 = vcmp.lt.u32.totalorder %v587_v8, 3435973836 }
 0x153   :  { %vm278_vm4 = vcmp.gt.f32.partialorder %v271_v14, 0.0 }
 0x154   :  { %vm280_vm5 = vmand %vm276_vm1, %vm278_vm4 }
 0x155   :  { %734 = vmatprep.mubr.msk.f32.mxu1 %vm280_vm5, %v271_v14 }
 0x156   :  { %735 = vmatmul.mubr.msk.f32.vlgmr.msra.gmra.mxu1 %vm279_vm6, %v269_v11 }
 0x157   :  { %743 = vmatpush3.msra.mxu1 %v612_v24 }
 0x158   :  { %744 = vmatprep.subr.mxu1 %v627_v25 }
 0x159   :  { %745 = vmatpush3.msra.mxu1 %v611_v26 }
 0x15a   :  { %746 = vmatprep.subr.mxu1 %v626_v27 }
 0x15b   :  { %747 = vmatpush3.msra.mxu1 %v610_v28 }
 0x15c   :  { %748 = vmatprep.subr.mxu1 %v625_v29 }
 0x15d   :  { %749 = vmatpush3.msra.mxu1 %v609_v30 }
 0x15e   :  { %750 = vmatprep.subr.mxu1 %v624_v31 }
 0x15f   :  { %751 = vmatpush3.msra.mxu1 %v608_v32 }
 0x160   :  { %752 = vmatprep.subr.mxu1 %v623_v33 }
 0x161   :  { %753 = vmatpush3.msra.mxu1 %v607_v34 }
 0x162   :  { %754 = vmatprep.subr.mxu1 %v622_v35 }
 0x163   :  { %755 = vmatpush3.msra.mxu1 %v606_v36 }
 0x164   :  { %756 = vmatprep.subr.mxu1 %v621_v37 }
 0x165   :  { %757 = vmatpush3.msra.mxu1 %v605_v38 }
 0x166   :  { %758 = vmatprep.subr.mxu1 %v620_v39 }
 0x167   :  { %759 = vmatpush3.msra.mxu1 %v604_v40 }
 0x168   :  { %760 = vmatprep.subr.mxu1 %v619_v41 }
 0x169   :  { %761 = vmatpush3.msra.mxu1 %v603_v42 }
 0x16a   :  { %762 = vmatprep.subr.mxu1 %v618_v43 }
 0x16b   :  { %763 = vmatpush3.msra.mxu1 %v602_v44 }
 0x16c   :  { %764 = vmatprep.subr.mxu1 %v617_v45 }
 0x16d   :  { %765 = vmatpush3.msra.mxu1 %v601_v46 }
 0x16e   :  { %766 = vmatprep.subr.mxu1 %v616_v56 }
 0x16f   :  { %767 = vmatpush3.msra.mxu1 %v600_v57 }
 0x170   :  { %768 = vmatprep.subr.mxu1 %v615_v58 }
 0x171   :  { %769 = vmatpush3.msra.mxu1 %v599_v59 }
 0x172   :  { %770 = vmatprep.subr.mxu1 %v614_v60 }
 0x173   :  { %771 = vmatpush3.msra.mxu1 %v598_v61 }
 0x174   :  { %772 = vmatprep.subr.mxu1 %v613_v62 }
 0x175   :  { %773 = vmatpush3.msra.mxu1 %v597_v63 }
 0x216   :  { %v425_v50 = vpop.f32.mrf.mxu1 }
 0x217   :  { %v426_v52 = vadd.f32 %v425_v50, %v352_v48 }
 0x218   :  { %v427_v54 = vpop.f32.mrf.mxu1 }
 0x219   :  { %v428_v55 = vadd.f32 %v427_v54, %v356_v49  ;;  %vm434_vm9 = vcmp.gt.f32.partialorder %v426_v52, 0.0 }
 0x21a   :  { %vm436_vm12 = vmand %vm432_vm8, %vm434_vm9 }
 0x21b   :  { %vm435_vm10 = vcmp.gt.f32.partialorder %v428_v55, 0.0 }
 0x21c   :  { %vm437_vm11 = vmand %vm433_vm7, %vm435_vm10 }
 0x21d   :  { %736 = vmatprep.mubr.msk.f32.mxu0 %vm437_vm11, %v428_v55 }
 0x21e   :  { %737 = vmatmul.mubr.msk.f32.vlgmr.msra.gmra.mxu0 %vm436_vm12, %v426_v52 }
 0x2de   :  { %v582_v3 = vpop.f32.mrf.mxu0 }
 0x2df   :  { %v583_v7 = vadd.f32 %v582_v3, %v509_v1 }
 0x2e0   :  { %v584_v9 = vpop.f32.mrf.mxu0 }
 0x2e1   :  { %v585_v10 = vadd.f32 %v584_v9, %v513_v2  ;;  %vm591_vm15 = vcmp.gt.f32.partialorder %v583_v7, 0.0 }
 0x2e2   :  { %vm593_vm2 = vmand %vm589_vm14, %vm591_vm15 }
 0x2e3   :  { %vm592_vm0 = vcmp.gt.f32.partialorder %v585_v10, 0.0 }
 0x2e4   :  { %vm594_vm1 = vmand %vm590_vm13, %vm592_vm0 }
 0x2e5   :  { %739 = vmatprep.mubr.msk.f32.mxu1 %vm594_vm1, %v585_v10 }
 0x2e6   :  { %740 = vmatmul.mubr.msk.f32.vlgmr.msra.gmra.mxu1 %vm593_vm2, %v583_v7 }
 0x3a6   :  { %v774_v11 = vpop.f32.mrf.mxu1 }
 0x3a8   :  { %v775_v13 = vpop.f32.mrf.mxu1 }
 0x3a9   :  { %v776_v4 = vadd.f32 %v775_v13, %v774_v11 }
 0x3ab   :  { %v703_v14 = vadd.f32 %v776_v4, %v738_v12 }
 0x3ad   :  { %v741_v6 = vmul.f32 -1.442695, %v703_v14 }
 0x3af   :  { %794 = vpow2.f32 %v741_v6 }
 0x3bc   :  { %v795_v15 = vpop.eup %794 }
 0x3bd   :  { %v709_v16 = vadd.f32 1.0, %v795_v15 }
 0x3bf   :  { %796 = vrcp.f32 %v709_v16 }
 0x3cc   :  { %v797_v17 = vpop.eup %796 }
 0x3cd   :  { %712 = vst [vmem:[#allocation20] sm:$0xff] %v797_v17 }
 0x3ce   :  { %1029 = shalt.err (!%p1026_p3)
}
 0x3cf   :  { %722 = dma.vmem_to_hbm [thread:$0]  %s720_s16, 128, %s1198_s12, [#allocation4]  }
 0x3d0   :  { %1050 = dma.done.wait [#allocation4], 128  }
 0x3d1   :  { %1051 = vsyncadd [#allocation4], 4294967168 }
 0x3d2   :  { %726 = vsyncpa [#allocation3], 1 }
 0x3d3   :  { %727 = vsyncpa [#allocation6], 1 }
 0x3d4   :  { %728 = vsyncpa [#allocation9], 1 }
 0x3d5   :  { %729 = vsyncpa [#allocation12], 1 }
 0x3d6   :  { %730 = vsyncpa [#allocation15], 1 }
 0x3d7   :  { %731 = vsyncpa [#allocation18], 1 }
 0x3d8   :  { %732 = vsyncpa [#allocation4], 1 }

</bundles_post_ra>
